<compile_context>
chip_gen: v5e
topology: v5e:2x2
jax: 0.10.0
libtpu: 0.0.40
codegen_flags: <defaults>
</compile_context>

<pallas_src>
import jax
import jax.numpy as jnp
from jax import lax
from jax.experimental import pallas as pl
from jax.experimental.pallas import tpu as pltpu

NUM_FEATURES = 20
HIDDEN = 128
EMBED_DIM = 32
BN_EPS = 1e-5
_INV_SQRT2 = 0.7071067811865475

_DEFAULT_BATCH_TILE = 2048          # amortizes ~0.35us/grid-step overhead
_VMEM_LIMIT = 32 * 1024 * 1024      # explicit scoped-VMEM budget (safe on v5e/v6e/v7x)


def _gelu_exact(v):
    # PyTorch nn.GELU() default: exact erf-based GELU.
    return 0.5 * v * (1.0 + lax.erf(v * _INV_SQRT2))


def _round_up(n, m):
    return (n + m - 1) // m * m


def _make_stats_kernel(batch, tile, tiles_per_core, needs_mask):
    """Pass 1: per-core, per-sublane partial BN sums (sum | sum of squares)."""

    def stats_kernel(x_ref, w1_ref, b1_ref, acc_ref):
        c = pl.program_id(0)
        j = pl.program_id(1)

        @pl.when(j == 0)
        def _init():
            acc_ref[...] = jnp.zeros_like(acc_ref)

        h = _gelu_exact(
            jnp.dot(x_ref[...], w1_ref[...], preferred_element_type=jnp.float32)
            + b1_ref[...]
        )

        if needs_mask:
            # Zero rows with logical index >= batch: ragged last block (unspecified
            # data -> must use where, NaN*0 = NaN), micro-padded rows, and the
            # clamped duplicate tile of the 2-way core split.
            tile_idx = c * tiles_per_core + j
            row = lax.broadcasted_iota(jnp.int32, (tile, 1), 0) + tile_idx * tile
            h = jnp.where(row < batch, h, 0.0)

        # Per-sublane partial accumulation: pure VALU vreg adds, no per-step XLU
        # cross-sublane reduce (final 8-row reduce happens once in the wrapper).
        hp = h.reshape(tile // 8, 8, HIDDEN)
        part = jnp.concatenate([hp.sum(axis=0), (hp * hp).sum(axis=0)], axis=1)
        acc_ref[...] += part

    return stats_kernel


def _apply_kernel(x_ref, wcat_ref, bcat_ref, ss_ref, w2_ref, b2_ref, o_ref):
    """Pass 2: fused shallow+deep matmul, normalize with global stats, project."""
    xh = (jnp.dot(x_ref[...], wcat_ref[...], preferred_element_type=jnp.float32)
          + bcat_ref[...])
    out1 = xh[:, HIDDEN:]                              # shallow branch (no activation)
    h = _gelu_exact(xh[:, :HIDDEN])                    # deep branch hidden
    ss = ss_ref[...]
    h = h * ss[0:1, :] + ss[1:2, :]                    # BatchNorm via precomputed scale/shift
    h2 = jnp.dot(h, w2_ref[...], preferred_element_type=jnp.float32) + b2_ref[...]
    o_ref[...] = (out1 + _gelu_exact(h2)).astype(o_ref.dtype)


def expert_forward(x, params, *, batch_tile=None):
    """x: (B, NUM_FEATURES) float32 -> (B, EMBED_DIM) float32."""
    ws, bs, w1, b1, gamma, beta, w2, b2 = params
    B, F = x.shape

    # Fuse the two input-side matmuls for pass 2: cols [0:128)=w1 (deep), [128:160)=ws.
    w_cat = jnp.concatenate([w1, ws], axis=1)          # (F, HIDDEN + EMBED_DIM)
    b_cat = jnp.concatenate([b1, bs], axis=1)          # (1, HIDDEN + EMBED_DIM)

    tb = batch_tile if batch_tile is not None else _DEFAULT_BATCH_TILE
    tb = _round_up(min(tb, _round_up(B, 8)), 8)

    # Micro-pad (< 8 rows) only when a single block would exceed the array;
    # otherwise no wrapper-side pad/slice copies — ragged last block handled in-kernel.
    if tb > B:
        x_in = jnp.pad(x, ((0, tb - B), (0, 0)))
        rows = tb
    else:
        x_in = x
        rows = B

    nt = pl.cdiv(rows, tb)
    split = 2 if nt >= 2 else 1                        # shard pass-1 stats across 2 TCs (v7x)
    ntpc = pl.cdiv(nt, split)                          # tiles per core
    needs_mask = (split * ntpc * tb) != B

    def const_spec(shape):
        return pl.BlockSpec(shape, lambda *args: (0, 0))   # resident across grid steps

    def x_stats_map(c, j):
        # Clamp so duplicate (masked) steps of the core split stay in bounds.
        return (jnp.minimum(c * ntpc + j, nt - 1), 0)

    param_bytes = 4 * (w_cat.size + b_cat.size + w2.size + b2.size + 2 * HIDDEN)
    rows_p1 = split * ntpc * tb

    # ---- pass 1: per-core per-sublane partial sums -> (split, 8, 2*HIDDEN)
    stats_cost = pl.CostEstimate(
        flops=int(rows_p1 * (2 * F * HIDDEN + 6 * HIDDEN)),
        transcendentals=int(rows_p1 * HIDDEN),
        bytes_accessed=int(rows_p1 * F * 4 + param_bytes),
    )
    partial = pl.pallas_call(
        _make_stats_kernel(B, tb, ntpc, needs_mask),
        out_shape=jax.ShapeDtypeStruct((split, 8, 2 * HIDDEN), jnp.float32),
        grid=(split, ntpc),
        in_specs=[
            pl.BlockSpec((tb, F), x_stats_map),
            const_spec(w1.shape),
            const_spec(b1.shape),
        ],
        out_specs=pl.BlockSpec((None, 8, 2 * HIDDEN), lambda c, j: (c, 0, 0)),
        compiler_params=pltpu.CompilerParams(
            dimension_semantics=("parallel", "arbitrary"),
            vmem_limit_bytes=_VMEM_LIMIT),
        cost_estimate=stats_cost,
    )(x_in, w1, b1)

    # Tiny finalize in plain JAX: global mean/var -> (scale, shift), var clamped >= 0.
    sums = jnp.sum(partial, axis=(0, 1))               # (2*HIDDEN,)
    mean = sums[:HIDDEN] / B
    var = jnp.maximum(sums[HIDDEN:] / B - mean * mean, 0.0)
    scale = gamma * lax.rsqrt(var + BN_EPS)            # (1, HIDDEN)
    shift = beta - mean * scale                        # (1, HIDDEN)
    scale_shift = jnp.concatenate([scale, shift], axis=0)   # (2, HIDDEN)

    # ---- pass 2: apply (embarrassingly parallel over batch tiles)
    apply_cost = pl.CostEstimate(
        flops=int(rows * 2 * (F * (HIDDEN + EMBED_DIM) + HIDDEN * EMBED_DIM)),
        transcendentals=int(rows * (HIDDEN + EMBED_DIM)),
        bytes_accessed=int(rows * (F + EMBED_DIM) * 4 + param_bytes),
    )
    out = pl.pallas_call(
        _apply_kernel,
        out_shape=jax.ShapeDtypeStruct((rows, EMBED_DIM), jnp.float32),
        grid=(nt,),
        in_specs=[
            pl.BlockSpec((tb, F), lambda i: (i, 0)),
            const_spec(w_cat.shape),
            const_spec(b_cat.shape),
            const_spec((2, HIDDEN)),
            const_spec(w2.shape),
            const_spec(b2.shape),
        ],
        out_specs=pl.BlockSpec((tb, EMBED_DIM), lambda i: (i, 0)),
        compiler_params=pltpu.CompilerParams(
            dimension_semantics=("parallel",),
            vmem_limit_bytes=_VMEM_LIMIT),
        cost_estimate=apply_cost,
    )(x_in, w_cat, b_cat, scale_shift, w2, b2)

    return out[:B] if rows != B else out


def init_params(key):
    """Deterministic parameter init (PyTorch Linear-style uniform bounds)."""
    ks = jax.random.split(key, 6)

    def linear(kw, kb, fan_in, fan_out):
        bound = 1.0 / jnp.sqrt(fan_in)
        w = jax.random.uniform(kw, (fan_in, fan_out), jnp.float32, -bound, bound)
        b = jax.random.uniform(kb, (1, fan_out), jnp.float32, -bound, bound)
        return w, b

    ws, bs = linear(ks[0], ks[1], NUM_FEATURES, EMBED_DIM)       # shallow
    w1, b1 = linear(ks[2], ks[3], NUM_FEATURES, HIDDEN)          # deep.0
    gamma = jnp.ones((1, HIDDEN), jnp.float32)                   # BatchNorm weight
    beta = jnp.zeros((1, HIDDEN), jnp.float32)                   # BatchNorm bias
    w2, b2 = linear(ks[4], ks[5], HIDDEN, EMBED_DIM)             # deep.3
    return ws, bs, w1, b1, gamma, beta, w2, b2


def expert_reference(x, params):
    """Pure-JAX reference for validation (two-pass BN, exact GELU)."""
    ws, bs, w1, b1, gamma, beta, w2, b2 = params
    out1 = x @ ws + bs
    h = jax.nn.gelu(x @ w1 + b1, approximate=False)
    mean = jnp.mean(h, axis=0, keepdims=True)
    var = jnp.mean((h - mean) ** 2, axis=0, keepdims=True)
    h = (h - mean) / jnp.sqrt(var + BN_EPS) * gamma + beta
    out2 = jax.nn.gelu(h @ w2 + b2, approximate=False)
    return out1 + out2


if __name__ == "__main__":
    key = jax.random.PRNGKey(0)
    kx, kx2, kp = jax.random.split(key, 3)
    params = init_params(kp)

    # Case 1: tiny single-tile batch (no masking path).
    B = 8
    x = jax.random.normal(kx, (B, NUM_FEATURES), jnp.float32)
    out = jax.block_until_ready(expert_forward(x, params))
    ref = expert_reference(x, params)
    assert out.shape == (B, EMBED_DIM)
    assert jnp.allclose(out, ref, atol=2e-4, rtol=2e-4), "mismatch (single tile)"

    # Case 2: multi-tile batch, ragged last block + 2-way stats core split with a
    # clamped duplicate tile (exercises masked global BN stats, no wrapper pad).
    B2 = 20
    x2 = jax.random.normal(kx2, (B2, NUM_FEATURES), jnp.float32)
    out2 = jax.block_until_ready(expert_forward(x2, params, batch_tile=8))
    ref2 = expert_reference(x2, params)
    assert out2.shape == (B2, EMBED_DIM)
    assert jnp.allclose(out2, ref2, atol=2e-4, rtol=2e-4), "mismatch (multi tile)"

    # Case 3: default tile with B not a multiple of 8 (micro-pad < 8 rows path).
    out3 = jax.block_until_ready(expert_forward(x2, params))
    assert out3.shape == (B2, EMBED_DIM)
    assert jnp.allclose(out3, ref2, atol=2e-4, rtol=2e-4), "mismatch (micro-pad)"

    print("KERNEL_OK")
</pallas_src>

<mosaic_0001>
module attributes {stable_mosaic.version = 11 : i64} {
  func.func @stats_kernel(%arg0: i32, %arg1: i32, %arg2: memref<8x20xf32, #tpu.memory_space<vmem>>, %arg3: memref<20x128xf32, #tpu.memory_space<vmem>>, %arg4: memref<1x128xf32, #tpu.memory_space<vmem>>, %arg5: memref<1x8x256xf32, #tpu.memory_space<vmem>>) attributes {dimension_semantics = [#tpu.dimension_semantics<parallel>, #tpu.dimension_semantics<arbitrary>], iteration_bounds = array<i64: 1, 1>, scalar_prefetch = 0 : i64, scratch_operands = 0 : i64, tpu.core_type = #tpu.core_type<tc>, window_params = [{transform_indices = @transform_0, window_bounds = array<i64: 8, 20>}, {pipeline_mode = #tpu.pipeline_mode<synchronous>, transform_indices = @transform_1, window_bounds = array<i64: 20, 128>}, {pipeline_mode = #tpu.pipeline_mode<synchronous>, transform_indices = @transform_2, window_bounds = array<i64: 1, 128>}, {transform_indices = @transform_3, window_bounds = array<i64: 1, 8, 256>}]} {
    %c0_i32 = arith.constant 0 : i32
    %0 = arith.cmpi eq, %arg1, %c0_i32 : i32
    %1 = arith.extui %0 : i1 to i32
    %c0_i32_0 = arith.constant 0 : i32
    %2 = arith.cmpi ne, %1, %c0_i32_0 : i32
    scf.if %2 {
      %cst_17 = arith.constant 0.000000e+00 : f32
      %28 = vector.broadcast %cst_17 : f32 to vector<8x256xf32>
      %c0_18 = arith.constant 0 : index
      %c0_19 = arith.constant 0 : index
      %c0_20 = arith.constant 0 : index
      %29 = vector.load %arg5[%c0_18, %c0_19, %c0_20] : memref<1x8x256xf32, #tpu.memory_space<vmem>>, vector<1x8x256xf32>
      %30 = vector.shape_cast %29 : vector<1x8x256xf32> to vector<8x256xf32>
      %31 = vector.shape_cast %28 : vector<8x256xf32> to vector<1x8x256xf32>
      tpu.vector_store %arg5[%c0_18, %c0_19, %c0_20], %31 {strides = array<i32>} : memref<1x8x256xf32, #tpu.memory_space<vmem>>, vector<1x8x256xf32>,
    } else {
    }
    %c0 = arith.constant 0 : index
    %c0_1 = arith.constant 0 : index
    %3 = vector.load %arg2[%c0, %c0_1] : memref<8x20xf32, #tpu.memory_space<vmem>>, vector<8x20xf32>
    %c0_2 = arith.constant 0 : index
    %c0_3 = arith.constant 0 : index
    %4 = vector.load %arg3[%c0_2, %c0_3] : memref<20x128xf32, #tpu.memory_space<vmem>>, vector<20x128xf32>
    %cst = arith.constant dense<0.000000e+00> : vector<8x128xf32>
    %5 = tpu.matmul %3, %4, %cst {dimension_numbers = #tpu.dot_dimension_numbers<[1], [0], [0], [1], [0, 0, 1, 1], [], []>} : vector<8x20xf32>, vector<20x128xf32>, vector<8x128xf32> -> vector<8x128xf32>
    %c0_4 = arith.constant 0 : index
    %c0_5 = arith.constant 0 : index
    %6 = vector.load %arg4[%c0_4, %c0_5] : memref<1x128xf32, #tpu.memory_space<vmem>>, vector<1x128xf32>
    %7 = vector.broadcast %6 : vector<1x128xf32> to vector<8x128xf32>
    %8 = arith.addf %5, %7 : vector<8x128xf32>
    %cst_6 = arith.constant 5.000000e-01 : f32
    %9 = vector.broadcast %cst_6 : f32 to vector<8x128xf32>
    %10 = arith.mulf %9, %8 : vector<8x128xf32>
    %cst_7 = arith.constant 0.707106769 : f32
    %11 = vector.broadcast %cst_7 : f32 to vector<8x128xf32>
    %12 = arith.mulf %8, %11 : vector<8x128xf32>
    %13 = math.erf %12 : vector<8x128xf32>
    %cst_8 = arith.constant 1.000000e+00 : f32
    %14 = vector.broadcast %cst_8 : f32 to vector<8x128xf32>
    %15 = arith.addf %14, %13 : vector<8x128xf32>
    %16 = arith.mulf %10, %15 : vector<8x128xf32>
    %17 = vector.shape_cast %16 : vector<8x128xf32> to vector<1x8x128xf32>
    %cst_9 = arith.constant dense<0.000000e+00> : vector<8x128xf32>
    %18 = vector.multi_reduction <add>, %17, %cst_9 [0] : vector<1x8x128xf32> to vector<8x128xf32>
    %19 = arith.mulf %17, %17 : vector<1x8x128xf32>
    %cst_10 = arith.constant dense<0.000000e+00> : vector<8x128xf32>
    %20 = vector.multi_reduction <add>, %19, %cst_10 [0] : vector<1x8x128xf32> to vector<8x128xf32>
    %21 = tpu.concatenate %18, %20 in 1 : vector<8x128xf32>, vector<8x128xf32> -> vector<8x256xf32>
    %c0_11 = arith.constant 0 : index
    %c0_12 = arith.constant 0 : index
    %c0_13 = arith.constant 0 : index
    %22 = vector.load %arg5[%c0_11, %c0_12, %c0_13] : memref<1x8x256xf32, #tpu.memory_space<vmem>>, vector<1x8x256xf32>
    %23 = vector.shape_cast %22 : vector<1x8x256xf32> to vector<8x256xf32>
    %24 = arith.addf %23, %21 : vector<8x256xf32>
    %c0_14 = arith.constant 0 : index
    %c0_15 = arith.constant 0 : index
    %c0_16 = arith.constant 0 : index
    %25 = vector.load %arg5[%c0_14, %c0_15, %c0_16] : memref<1x8x256xf32, #tpu.memory_space<vmem>>, vector<1x8x256xf32>
    %26 = vector.shape_cast %25 : vector<1x8x256xf32> to vector<8x256xf32>
    %27 = vector.shape_cast %24 : vector<8x256xf32> to vector<1x8x256xf32>
    tpu.vector_store %arg5[%c0_14, %c0_15, %c0_16], %27 {strides = array<i32>} : memref<1x8x256xf32, #tpu.memory_space<vmem>>, vector<1x8x256xf32>,
    return
  }
  func.func @transform_0(%arg0: i32, %arg1: i32) -> (i32, i32) {
    %c1_i32 = arith.constant 1 : i32
    %0 = arith.muli %arg0, %c1_i32 : i32
    %1 = arith.addi %0, %arg1 : i32
    %c0_i32 = arith.constant 0 : i32
    %2 = arith.minsi %1, %c0_i32 : i32
    %c0_i32_0 = arith.constant 0 : i32
    %c0_i32_1 = arith.constant 0 : i32
    return %2, %c0_i32_0 : i32, i32
  }
  func.func @transform_1(%arg0: i32, %arg1: i32) -> (i32, i32) {
    %c0_i32 = arith.constant 0 : i32
    %c0_i32_0 = arith.constant 0 : i32
    %c0_i32_1 = arith.constant 0 : i32
    return %c0_i32, %c0_i32_0 : i32, i32
  }
  func.func @transform_2(%arg0: i32, %arg1: i32) -> (i32, i32) {
    %c0_i32 = arith.constant 0 : i32
    %c0_i32_0 = arith.constant 0 : i32
    %c0_i32_1 = arith.constant 0 : i32
    return %c0_i32, %c0_i32_0 : i32, i32
  }
  func.func @transform_3(%arg0: i32, %arg1: i32) -> (i32, i32, i32) {
    %c0_i32 = arith.constant 0 : i32
    %c0_i32_0 = arith.constant 0 : i32
    %c0_i32_1 = arith.constant 0 : i32
    return %arg0, %c0_i32, %c0_i32_0 : i32, i32, i32
  }
}

</mosaic_0001>

<bundles_post_ra>
// kernel: tpu_custom_call.1
= control target key start
LH: loop header
LB: loop body
LE: loop exit
PB: predicated region body
PF: predicated region fallthrough
CT: control target
= control target key end

     0   :  { %8 = vsyncpa [#allocation3], 0  ;;  %s295_s0 = inlined_call_operand.hbm [shape: f32[8,20], index: 0, kind: input, shape index: {}]   ;;  %s296_s1 = inlined_call_operand.hbm [shape: f32[20,128], index: 1, kind: input, shape index: {}]   ;;  %s297_s2 = inlined_call_operand.vmem [shape: f32[1,128], index: 2, kind: input, shape index: {}]   ;;  %s298_s3 = inlined_call_operand.hbm [shape: f32[1,8,256], index: 3, kind: output, shape index: {}]  }
   0x1   :  { %9 = vsyncpa [#allocation6], 0 }
   0x2   :  { %10 = vsyncpa [#allocation4], 0  ;;  %s21_s14 = sshll.u32 %s295_s0, 4  ;;  %s258_s15 = smov [#allocation2]   ;;  %s22_s14 = int_to_ptr.hbm [resolvable:$true] %s21_s14 }
   0x3   :  { %s23_s16 = sshll.u32 %s258_s15, 4  ;;  %s31_s19 = sshll.u32 %s296_s1, 4  ;;  %s24_s16 = int_to_ptr.vmem [resolvable:$true] %s23_s16  ;;  %s32_s19 = int_to_ptr.hbm [resolvable:$true] %s31_s19 }
   0x4   :  { %26 = dma.hbm_to_vmem [thread:$0]  %s22_s14, 128, %s24_s16, [#allocation3]  }
   0x5   :  { %s259_s20 = smov [#allocation5]   ;;  %s260_s22 = smov 128  }
   0x6   :  { %s33_s21 = sshll.u32 %s259_s20, 4  ;;  %s261_s23 = smov 8   ;;  %s34_s21 = int_to_ptr.vmem [resolvable:$true] %s33_s21 }
   0x7   :  { %39 = dma.hbm_to_vmem [thread:$0]  %s32_s19, 384, %s34_s21, [#allocation6], %s260_s22, %s260_s22, %s261_s23  }
   0x8   :  { %252 = dma.done.wait [#allocation3], 128  }
   0x9   :  { %253 = vsyncadd [#allocation3], 4294967168 }
   0xa   :  { %254 = dma.done.wait [#allocation6], 384  }
   0xb   :  { %255 = vsyncadd [#allocation6], 4294966912  ;;  %vm71_vm0 = vcmask 1043456   ;;  %v62_v0 = vld [vmem:[#allocation5 + $0x10] sm:$0xf]  ;;  %v61_v1 = vld [vmem:[#allocation5 + $0x8] sm:$0xff] }
   0xc   :  { %168 = vmatpush.msk.msra.mxu0 %vm71_vm0, %v62_v0  ;;  %v60_v2 = vld [vmem:[#allocation5] sm:$0xff]  ;;  %v59_v3 = vld [vmem:[#allocation2] sm:$0xff]  ;;  %vm67_vm1 = vcmask 162816   ;;  %s155_s27 = sshll.u32 %s298_s3, 4  ;;  %s156_s27 = int_to_ptr.hbm [resolvable:$true] %s155_s27 }
   0xd   :  { %v177_v4 = vld [vmem:[%s297_s2] ss:$0 sm:$0xff]  ;;  %s262_s2 = smov [#allocation7]  }
   0xe   :  { %89 = vmatpush.msra.mxu0 %v61_v1  ;;  %s153_s24 = sshll.u32 %s262_s2, 4  ;;  %s154_s24 = int_to_ptr.vmem [resolvable:$true] %s153_s24 }
  0x10   :  { %90 = vmatpush.msra.mxu0 %v60_v2 }
  0x11   :  { %169 = vmatmul.msk.f32.vlgmr.msra.gmra.mxu0 %vm67_vm1, %v59_v3 }
  0x8e   :  { %v92_v5 = vpop.f32.mrf.mxu0 }
  0x8f   :  { %v93_v6 = vadd.f32 %v177_v4, %v92_v5 }
  0x91   :  { %v96_v7 = vmul.f32 0.70710677, %v93_v6  ;;  %v95_v43 = vmul.f32 0.5, %v93_v6 }
  0x93   :  { %v97_v8 = vmul.f32 %v96_v7, %v96_v7 }
  0x95   :  { %v98_v9 = vmin.f32 %v97_v8, 16.0 }
  0x97   :  { %v99_v10 = vmul.f32 2.1237322e-06, %v98_v9  ;;  %v110_v11 = vmul.f32 3.8918573e-05, %v98_v9 }
  0x99   :  { %v100_v12 = vadd.f32 0.00028619796, %v99_v10  ;;  %v111_v13 = vadd.f32 0.001143296, %v110_v11 }
  0x9b   :  { %v101_v14 = vmul.f32 %v100_v12, %v98_v9  ;;  %v112_v15 = vmul.f32 %v111_v13, %v98_v9 }
  0x9d   :  { %v113_v16 = vadd.f32 0.014752088, %v112_v15  ;;  %v102_v17 = vadd.f32 0.0036580483, %v101_v14 }
  0x9f   :  { %v114_v18 = vmul.f32 %v113_v16, %v98_v9  ;;  %v103_v20 = vmul.f32 %v102_v17, %v98_v9 }
  0xa1   :  { %v115_v19 = vadd.f32 0.112945676, %v114_v18  ;;  %v104_v23 = vadd.f32 0.05243302, %v103_v20 }
  0xa3   :  { %v116_v21 = vmul.f32 %v115_v19, %v98_v9  ;;  %v105_v26 = vmul.f32 %v104_v23, %v98_v9 }
  0xa5   :  { %v117_v22 = vadd.f32 0.4994258, %v116_v21  ;;  %v106_v27 = vadd.f32 0.18741608, %v105_v26 }
  0xa7   :  { %v118_v24 = vmul.f32 %v117_v22, %v98_v9  ;;  %v107_v29 = vmul.f32 %v106_v27, %v98_v9 }
  0xa9   :  { %v119_v25 = vadd.f32 1.0, %v118_v24  ;;  %v108_v33 = vadd.f32 1.1283791, %v107_v29 }
  0xab   :  { %178 = vrcp.f32 %v119_v25  ;;  %v131_v32 = vand.u32 2147483648, %v119_v25  ;;  %v129_v35 = vand.u32 2147483647, %v119_v25  ;;  %vm125_vm3 = vweird.f32 %v119_v25 }
  0xac   :  { %v109_v38 = vmul.f32 %v108_v33, %v96_v7 }
  0xad   :  { %v132_v37 = vor.u32 1.1754944e-38, %v131_v32  ;;  %vm130_vm5 = vcmp.eq.f32.partialorder %v129_v35, 8.507059e+37 }
  0xb1   :  { %v179_v28 = vpop.eup %178 }
  0xb2   :  { %v121_v30 = vmul.f32 %v179_v28, %v119_v25  ;;  %vm126_vm2 = vweird.f32 %v179_v28 }
  0xb3   :  { %vm127_vm4 = vmor %vm125_vm3, %vm126_vm2 }
  0xb4   :  { %v122_v31 = vsub.f32 1.0, %v121_v30 }
  0xb6   :  { %v123_v34 = vmul.f32 %v179_v28, %v122_v31 }
  0xb8   :  { %v124_v36 = vadd.f32 %v179_v28, %v123_v34 }
  0xba   :  { %v128_v39 = vsel %vm127_vm4, %v179_v28, %v124_v36 }
  0xbb   :  { %v133_v40 = vsel %vm130_vm5, %v132_v37, %v128_v39 }
  0xbc   :  { %v134_v41 = vmul.f32 %v133_v40, %v109_v38 }
  0xbe   :  { %v170_v42 = vclamps-f32 %v134_v41, 1.0 }
  0xc0   :  { %v137_v44 = vadd.f32 1.0, %v170_v42 }
  0xc2   :  { %v138_v45 = vmul.f32 %v137_v44, %v95_v43 }
  0xc4   :  { %v140_v46 = vmul.f32 %v138_v45, %v138_v45  ;;  %146 = vst [vmem:[#allocation7] sm:$0xff] %v138_v45 }
  0xc6   :  { %147 = vst [vmem:[#allocation7 + $0x8] sm:$0xff] %v140_v46 }
  0xc7   :  { %158 = dma.vmem_to_hbm [thread:$0]  %s154_s24, 256, %s156_s27, [#allocation4]  }
  0xc8   :  { %256 = dma.done.wait [#allocation4], 256  }
  0xc9   :  { %257 = vsyncadd [#allocation4], 4294967040 }
  0xca   :  { %163 = vsyncpa [#allocation3], 1 }
  0xcb   :  { %164 = vsyncpa [#allocation6], 1 }
  0xcc   :  { %165 = vsyncpa [#allocation4], 1 }

</bundles_post_ra>
